<compile_context>
chip_gen: v6e
topology: v6e:2x2x1
jax: 0.10.0
libtpu: 0.0.40
codegen_flags: <defaults>
</compile_context>

<pallas_src>
import jax
import jax.numpy as jnp
from jax.experimental import pallas as pl
from jax.experimental.pallas import tpu as pltpu


# ---------------------------------------------------------------------------
# Generic single-block pallas_call helper: at these sizes every operand is one
# full-array block resident in VMEM.
# ---------------------------------------------------------------------------
def _full_block_call(kernel, inputs, out_shape):
    in_specs = [pl.BlockSpec(a.shape, lambda i, nd=a.ndim: (0,) * nd) for a in inputs]
    out_specs = pl.BlockSpec(out_shape.shape,
                             lambda i, nd=len(out_shape.shape): (0,) * nd)
    return pl.pallas_call(
        kernel,
        grid=(1,),
        in_specs=in_specs,
        out_specs=out_specs,
        out_shape=out_shape,
        compiler_params=pltpu.CompilerParams(dimension_semantics=("arbitrary",)),
    )(*inputs)


# ---------------------------------------------------------------------------
# Fused GNN layer kernel:
#   gather (one-hot MXU matmul)  ->  split-weight message linear + bias + relu
#   -> scatter-add (one-hot^T MXU matmul) -> split-weight update linear + bias
#   + relu [+ residual]
# ---------------------------------------------------------------------------
def _make_gnn_layer_kernel(res_conn: bool):
    def kernel(src_ref, dst_ref, h_ref, xe_ref,
               wmh_ref, wme_ref, bm_ref,
               wuh_ref, wua_ref, bu_ref, o_ref):
        h = h_ref[...]                                 # (N, d_in)
        N = h_ref.shape[0]
        E = xe_ref.shape[0]

        # Gather H[src]: one-hot (E, N) built in-kernel (VPU compares only).
        gather_oh = (jax.lax.broadcasted_iota(jnp.int32, (E, N), 1)
                     == src_ref[...]).astype(jnp.float32)
        h_src = jnp.dot(gather_oh, h, preferred_element_type=jnp.float32)   # (E, d_in)

        # Message: relu(H[src] @ Wm_h + X_e @ Wm_e + bm)  (split-weight concat).
        msg = (jnp.dot(h_src, wmh_ref[...], preferred_element_type=jnp.float32)
               + jnp.dot(xe_ref[...], wme_ref[...], preferred_element_type=jnp.float32)
               + bm_ref[...])
        msg = jnp.maximum(msg, 0.0)                    # (E, hidden)

        # Sum aggregation to dst: one-hot^T (N, E) built in-kernel.
        scatter_oh = (jax.lax.broadcasted_iota(jnp.int32, (N, E), 0)
                      == dst_ref[...]).astype(jnp.float32)
        aggr = jnp.dot(scatter_oh, msg, preferred_element_type=jnp.float32)  # (N, h)

        # Update: relu(H @ Wu_h + aggr @ Wu_a + bu)  [+ H residual].
        upd = (jnp.dot(h, wuh_ref[...], preferred_element_type=jnp.float32)
               + jnp.dot(aggr, wua_ref[...], preferred_element_type=jnp.float32)
               + bu_ref[...])
        upd = jnp.maximum(upd, 0.0)
        if res_conn:
            upd = upd + h
        o_ref[...] = upd

    return kernel


def fused_gnn_layer(p, H, src_col, dst_row, X_e, *, res_conn):
    N = H.shape[0]
    hidden = p["wm_h"].shape[1]
    inputs = [src_col, dst_row, H, X_e,
              p["wm_h"], p["wm_e"], p["bm"],
              p["wu_h"], p["wu_a"], p["bu"]]
    return _full_block_call(_make_gnn_layer_kernel(res_conn), inputs,
                            jax.ShapeDtypeStruct((N, hidden), jnp.float32))


# ---------------------------------------------------------------------------
# Fused Virtual Node kernel: pool (one-hot matmul) -> linear + relu ->
# broadcast back to nodes (one-hot matmul) -> residual add.
# ---------------------------------------------------------------------------
def _make_virtual_node_kernel(num_graphs: int):
    def kernel(brow_ref, bcol_ref, h_ref, w_ref, b_ref, o_ref):
        h = h_ref[...]                                 # (N, h)
        N = h_ref.shape[0]
        B = num_graphs

        pool_oh = (jax.lax.broadcasted_iota(jnp.int32, (B, N), 0)
                   == brow_ref[...]).astype(jnp.float32)             # (B, N)
        pooled = jnp.dot(pool_oh, h, preferred_element_type=jnp.float32)   # (B, h)
        vn = jnp.maximum(
            jnp.dot(pooled, w_ref[...], preferred_element_type=jnp.float32)
            + b_ref[...], 0.0)                                        # (B, h)

        gather_oh = (jax.lax.broadcasted_iota(jnp.int32, (N, B), 1)
                     == bcol_ref[...]).astype(jnp.float32)            # (N, B)
        o_ref[...] = h + jnp.dot(gather_oh, vn, preferred_element_type=jnp.float32)

    return kernel


def fused_virtual_node(p, H, batch_row, batch_col, num_graphs):
    N, hidden = H.shape
    inputs = [batch_row, batch_col, H, p["w"], p["b"]]
    return _full_block_call(_make_virtual_node_kernel(num_graphs), inputs,
                            jax.ShapeDtypeStruct((N, hidden), jnp.float32))


# ---------------------------------------------------------------------------
# Fused readout: Sparse_Sum_Pooling + dropout1(identity) + MLP + dropout2
# (identity) + fused ReLU.
# ---------------------------------------------------------------------------
def _make_readout_kernel(num_graphs: int):
    def kernel(brow_ref, h_ref, w_ref, b_ref, o_ref):
        N = h_ref.shape[0]
        B = num_graphs
        pool_oh = (jax.lax.broadcasted_iota(jnp.int32, (B, N), 0)
                   == brow_ref[...]).astype(jnp.float32)
        pooled = jnp.dot(pool_oh, h_ref[...], preferred_element_type=jnp.float32)
        o_ref[...] = jnp.maximum(
            jnp.dot(pooled, w_ref[...], preferred_element_type=jnp.float32)
            + b_ref[...], 0.0)

    return kernel


def fused_readout(p, H, batch_row, num_graphs):
    hidden = H.shape[1]
    inputs = [batch_row, H, p["w"], p["b"]]
    return _full_block_call(_make_readout_kernel(num_graphs), inputs,
                            jax.ShapeDtypeStruct((num_graphs, hidden), jnp.float32))


# ---------------------------------------------------------------------------
# Parameter construction (deterministic, PyTorch-Linear-style init).
# Weights are pre-split and biases pre-reshaped ONCE here (not per call).
# ---------------------------------------------------------------------------
def init_linear(key, fan_in, fan_out):
    kw, kb = jax.random.split(key)
    bound = 1.0 / jnp.sqrt(jnp.float32(fan_in))
    w = jax.random.uniform(kw, (fan_in, fan_out), jnp.float32, -bound, bound)
    b = jax.random.uniform(kb, (fan_out,), jnp.float32, -bound, bound)
    return w, b


def init_gnn_params(key, hidden_dim, num_layers, node_attrs, edge_attrs, virtual_node):
    keys = jax.random.split(key, 4 + 3 * (num_layers - 1))
    ki = iter(keys)

    def layer_params(d_in):
        wm, bm = init_linear(next(ki), d_in + edge_attrs, hidden_dim)
        wu, bu = init_linear(next(ki), d_in + hidden_dim, hidden_dim)
        # Pre-split so the kernel does two clean dots instead of a concat.
        return {"wm_h": wm[:d_in], "wm_e": wm[d_in:], "bm": bm.reshape(1, hidden_dim),
                "wu_h": wu[:d_in], "wu_a": wu[d_in:], "bu": bu.reshape(1, hidden_dim)}

    params = {"input_layer": layer_params(node_attrs),
              "hidden_layers": [], "virtual_nodes": []}
    for _ in range(num_layers - 1):
        params["hidden_layers"].append(layer_params(hidden_dim))
        if virtual_node:
            wv, bv = init_linear(next(ki), hidden_dim, hidden_dim)
            params["virtual_nodes"].append({"w": wv, "b": bv.reshape(1, hidden_dim)})
    wm, bm = init_linear(next(ki), hidden_dim, hidden_dim)
    params["mlp"] = {"w": wm, "b": bm.reshape(1, hidden_dim)}
    wo, bo = init_linear(next(ki), hidden_dim, 1)
    params["out"] = {"w": wo, "b": bo}
    return params


# ---------------------------------------------------------------------------
# Forward pass
# ---------------------------------------------------------------------------
def gnn_forward(params, H, idx, X_e, batch_idx, *, num_graphs, num_layers,
                use_virtual_node):
    N = H.shape[0]
    E = X_e.shape[0]
    # Index vectors, laid out once in the shapes the kernels consume.
    src_col = idx[0].astype(jnp.int32).reshape(E, 1)
    dst_row = idx[1].astype(jnp.int32).reshape(1, E)
    batch_row = batch_idx.astype(jnp.int32).reshape(1, N)
    batch_col = batch_idx.astype(jnp.int32).reshape(N, 1)
    H = H.astype(jnp.float32)
    X_e = X_e.astype(jnp.float32)

    y = fused_gnn_layer(params["input_layer"], H, src_col, dst_row, X_e,
                        res_conn=False)
    for i in range(num_layers - 1):
        if use_virtual_node:
            y = fused_virtual_node(params["virtual_nodes"][i], y,
                                   batch_row, batch_col, num_graphs)
        y = fused_gnn_layer(params["hidden_layers"][i], y, src_col, dst_row, X_e,
                            res_conn=True)

    # Pooling + (dropout1 = identity) + MLP + (dropout2 = identity) + ReLU, fused.
    y = fused_readout(params["mlp"], y, batch_row, num_graphs)
    # Final 1-wide projection kept in plain XLA (lane-dense output guidance).
    return y @ params["out"]["w"] + params["out"]["b"]


# ---------------------------------------------------------------------------
# Pure-JAX reference (same split-weight math, jax.ops.segment_sum) for sanity.
# ---------------------------------------------------------------------------
def ref_forward(params, H, idx, X_e, batch_idx, *, num_graphs, num_layers,
                use_virtual_node):
    N = H.shape[0]
    src, dst = idx[0], idx[1]

    def layer(p, h, res_conn):
        msg = jnp.maximum(h[src] @ p["wm_h"] + X_e @ p["wm_e"] + p["bm"], 0.0)
        aggr = jax.ops.segment_sum(msg, dst, num_segments=N)
        y = jnp.maximum(h @ p["wu_h"] + aggr @ p["wu_a"] + p["bu"], 0.0)
        return y + h if res_conn else y

    y = layer(params["input_layer"], H.astype(jnp.float32), False)
    for i in range(num_layers - 1):
        if use_virtual_node:
            p = params["virtual_nodes"][i]
            pooled = jax.ops.segment_sum(y, batch_idx, num_segments=num_graphs)
            vn = jnp.maximum(pooled @ p["w"] + p["b"], 0.0)
            y = y + vn[batch_idx]
        y = layer(params["hidden_layers"][i], y, True)
    y = jax.ops.segment_sum(y, batch_idx, num_segments=num_graphs)
    y = jnp.maximum(y @ params["mlp"]["w"] + params["mlp"]["b"], 0.0)
    return y @ params["out"]["w"] + params["out"]["b"]


# ---------------------------------------------------------------------------
if __name__ == "__main__":
    # Small deterministic problem:
    #   2 graphs x 8 nodes, 32 directed edges total, 6 node attrs, 5 edge attrs,
    #   hidden_dim 32, 3 GNN layers, virtual node enabled.
    hidden_dim, num_layers = 32, 3
    node_attrs, edge_attrs = 6, 5
    num_graphs, nodes_per_graph = 2, 8
    N = num_graphs * nodes_per_graph
    E_dir = 32
    use_vn = True

    key = jax.random.PRNGKey(0)
    k_param, k_h, k_e, k_src, k_dst = jax.random.split(key, 5)

    params = init_gnn_params(k_param, hidden_dim, num_layers,
                             node_attrs, edge_attrs, use_vn)

    H = jax.random.normal(k_h, (N, node_attrs), jnp.float32)
    X_e = jax.random.normal(k_e, (E_dir, edge_attrs), jnp.float32)

    batch_idx = jnp.repeat(jnp.arange(num_graphs, dtype=jnp.int32), nodes_per_graph)
    # Directed edges, kept within each graph's node range.
    edge_graph = jnp.repeat(jnp.arange(num_graphs, dtype=jnp.int32),
                            E_dir // num_graphs)
    src_local = jax.random.randint(k_src, (E_dir,), 0, nodes_per_graph, jnp.int32)
    dst_local = jax.random.randint(k_dst, (E_dir,), 0, nodes_per_graph, jnp.int32)
    idx = jnp.stack([src_local + edge_graph * nodes_per_graph,
                     dst_local + edge_graph * nodes_per_graph], axis=0)   # (2, 2|E|)

    out = gnn_forward(params, H, idx, X_e, batch_idx,
                      num_graphs=num_graphs, num_layers=num_layers,
                      use_virtual_node=use_vn)
    out = jax.block_until_ready(out)
    assert out.shape == (num_graphs, 1) and out.dtype == jnp.float32
    assert bool(jnp.all(jnp.isfinite(out)))

    ref = ref_forward(params, H, idx, X_e, batch_idx,
                      num_graphs=num_graphs, num_layers=num_layers,
                      use_virtual_node=use_vn)
    # Loose tolerance: MXU pass decomposition differs from XLA's default matmul
    # precision; a real indexing/semantics bug would produce O(1) differences.
    assert jnp.allclose(out, ref, rtol=5e-2, atol=5e-2)

    print("KERNEL_OK")
</pallas_src>

<mosaic_0001>
module attributes {stable_mosaic.version = 11 : i64} {
  func.func @kernel(%arg0: i32, %arg1: memref<32x1xi32, #tpu.memory_space<vmem>>, %arg2: memref<1x32xi32, #tpu.memory_space<vmem>>, %arg3: memref<16x6xf32, #tpu.memory_space<vmem>>, %arg4: memref<32x5xf32, #tpu.memory_space<vmem>>, %arg5: memref<6x32xf32, #tpu.memory_space<vmem>>, %arg6: memref<5x32xf32, #tpu.memory_space<vmem>>, %arg7: memref<1x32xf32, #tpu.memory_space<vmem>>, %arg8: memref<6x32xf32, #tpu.memory_space<vmem>>, %arg9: memref<32x32xf32, #tpu.memory_space<vmem>>, %arg10: memref<1x32xf32, #tpu.memory_space<vmem>>, %arg11: memref<16x32xf32, #tpu.memory_space<vmem>>) attributes {dimension_semantics = [#tpu.dimension_semantics<arbitrary>], iteration_bounds = array<i64: 1>, scalar_prefetch = 0 : i64, scratch_operands = 0 : i64, tpu.core_type = #tpu.core_type<tc>, window_params = [{pipeline_mode = #tpu.pipeline_mode<synchronous>, transform_indices = @transform_0, window_bounds = array<i64: 32, 1>}, {pipeline_mode = #tpu.pipeline_mode<synchronous>, transform_indices = @transform_1, window_bounds = array<i64: 1, 32>}, {pipeline_mode = #tpu.pipeline_mode<synchronous>, transform_indices = @transform_2, window_bounds = array<i64: 16, 6>}, {pipeline_mode = #tpu.pipeline_mode<synchronous>, transform_indices = @transform_3, window_bounds = array<i64: 32, 5>}, {pipeline_mode = #tpu.pipeline_mode<synchronous>, transform_indices = @transform_4, window_bounds = array<i64: 6, 32>}, {pipeline_mode = #tpu.pipeline_mode<synchronous>, transform_indices = @transform_5, window_bounds = array<i64: 5, 32>}, {pipeline_mode = #tpu.pipeline_mode<synchronous>, transform_indices = @transform_6, window_bounds = array<i64: 1, 32>}, {pipeline_mode = #tpu.pipeline_mode<synchronous>, transform_indices = @transform_7, window_bounds = array<i64: 6, 32>}, {pipeline_mode = #tpu.pipeline_mode<synchronous>, transform_indices = @transform_8, window_bounds = array<i64: 32, 32>}, {pipeline_mode = #tpu.pipeline_mode<synchronous>, transform_indices = @transform_9, window_bounds = array<i64: 1, 32>}, {pipeline_mode = #tpu.pipeline_mode<synchronous>, transform_indices = @transform_10, window_bounds = array<i64: 16, 32>}]} {
    %c0 = arith.constant 0 : index
    %c0_0 = arith.constant 0 : index
    %0 = vector.load %arg3[%c0, %c0_0] : memref<16x6xf32, #tpu.memory_space<vmem>>, vector<16x6xf32>
    %1 = tpu.iota {dimensions = array<i32: 1>} : vector<32x16xi32>
    %c0_1 = arith.constant 0 : index
    %c0_2 = arith.constant 0 : index
    %2 = vector.load %arg1[%c0_1, %c0_2] : memref<32x1xi32, #tpu.memory_space<vmem>>, vector<32x1xi32>
    %3 = vector.broadcast %2 : vector<32x1xi32> to vector<32x16xi32>
    %4 = arith.cmpi eq, %1, %3 : vector<32x16xi32>
    %5 = arith.extui %4 : vector<32x16xi1> to vector<32x16xi32>
    %6 = arith.sitofp %5 : vector<32x16xi32> to vector<32x16xf32>
    %cst = arith.constant dense<0.000000e+00> : vector<32x6xf32>
    %7 = tpu.matmul %6, %0, %cst {dimension_numbers = #tpu.dot_dimension_numbers<[1], [0], [0], [1], [0, 0, 1, 1], [], []>} : vector<32x16xf32>, vector<16x6xf32>, vector<32x6xf32> -> vector<32x6xf32>
    %c0_3 = arith.constant 0 : index
    %c0_4 = arith.constant 0 : index
    %8 = vector.load %arg5[%c0_3, %c0_4] : memref<6x32xf32, #tpu.memory_space<vmem>>, vector<6x32xf32>
    %cst_5 = arith.constant dense<0.000000e+00> : vector<32x32xf32>
    %9 = tpu.matmul %7, %8, %cst_5 {dimension_numbers = #tpu.dot_dimension_numbers<[1], [0], [0], [1], [0, 0, 1, 1], [], []>} : vector<32x6xf32>, vector<6x32xf32>, vector<32x32xf32> -> vector<32x32xf32>
    %c0_6 = arith.constant 0 : index
    %c0_7 = arith.constant 0 : index
    %10 = vector.load %arg4[%c0_6, %c0_7] : memref<32x5xf32, #tpu.memory_space<vmem>>, vector<32x5xf32>
    %c0_8 = arith.constant 0 : index
    %c0_9 = arith.constant 0 : index
    %11 = vector.load %arg6[%c0_8, %c0_9] : memref<5x32xf32, #tpu.memory_space<vmem>>, vector<5x32xf32>
    %cst_10 = arith.constant dense<0.000000e+00> : vector<32x32xf32>
    %12 = tpu.matmul %10, %11, %cst_10 {dimension_numbers = #tpu.dot_dimension_numbers<[1], [0], [0], [1], [0, 0, 1, 1], [], []>} : vector<32x5xf32>, vector<5x32xf32>, vector<32x32xf32> -> vector<32x32xf32>
    %13 = arith.addf %9, %12 : vector<32x32xf32>
    %c0_11 = arith.constant 0 : index
    %c0_12 = arith.constant 0 : index
    %14 = vector.load %arg7[%c0_11, %c0_12] : memref<1x32xf32, #tpu.memory_space<vmem>>, vector<1x32xf32>
    %15 = vector.broadcast %14 : vector<1x32xf32> to vector<32x32xf32>
    %16 = arith.addf %13, %15 : vector<32x32xf32>
    %cst_13 = arith.constant 0.000000e+00 : f32
    %17 = vector.broadcast %cst_13 : f32 to vector<32x32xf32>
    %18 = arith.maximumf %16, %17 : vector<32x32xf32>
    %19 = tpu.iota {dimensions = array<i32: 0>} : vector<16x32xi32>
    %c0_14 = arith.constant 0 : index
    %c0_15 = arith.constant 0 : index
    %20 = vector.load %arg2[%c0_14, %c0_15] : memref<1x32xi32, #tpu.memory_space<vmem>>, vector<1x32xi32>
    %21 = vector.broadcast %20 : vector<1x32xi32> to vector<16x32xi32>
    %22 = arith.cmpi eq, %19, %21 : vector<16x32xi32>
    %23 = arith.extui %22 : vector<16x32xi1> to vector<16x32xi32>
    %24 = arith.sitofp %23 : vector<16x32xi32> to vector<16x32xf32>
    %cst_16 = arith.constant dense<0.000000e+00> : vector<16x32xf32>
    %25 = tpu.matmul %24, %18, %cst_16 {dimension_numbers = #tpu.dot_dimension_numbers<[1], [0], [0], [1], [0, 0, 1, 1], [], []>} : vector<16x32xf32>, vector<32x32xf32>, vector<16x32xf32> -> vector<16x32xf32>
    %c0_17 = arith.constant 0 : index
    %c0_18 = arith.constant 0 : index
    %26 = vector.load %arg8[%c0_17, %c0_18] : memref<6x32xf32, #tpu.memory_space<vmem>>, vector<6x32xf32>
    %cst_19 = arith.constant dense<0.000000e+00> : vector<16x32xf32>
    %27 = tpu.matmul %0, %26, %cst_19 {dimension_numbers = #tpu.dot_dimension_numbers<[1], [0], [0], [1], [0, 0, 1, 1], [], []>} : vector<16x6xf32>, vector<6x32xf32>, vector<16x32xf32> -> vector<16x32xf32>
    %c0_20 = arith.constant 0 : index
    %c0_21 = arith.constant 0 : index
    %28 = vector.load %arg9[%c0_20, %c0_21] : memref<32x32xf32, #tpu.memory_space<vmem>>, vector<32x32xf32>
    %cst_22 = arith.constant dense<0.000000e+00> : vector<16x32xf32>
    %29 = tpu.matmul %25, %28, %cst_22 {dimension_numbers = #tpu.dot_dimension_numbers<[1], [0], [0], [1], [0, 0, 1, 1], [], []>} : vector<16x32xf32>, vector<32x32xf32>, vector<16x32xf32> -> vector<16x32xf32>
    %30 = arith.addf %27, %29 : vector<16x32xf32>
    %c0_23 = arith.constant 0 : index
    %c0_24 = arith.constant 0 : index
    %31 = vector.load %arg10[%c0_23, %c0_24] : memref<1x32xf32, #tpu.memory_space<vmem>>, vector<1x32xf32>
    %32 = vector.broadcast %31 : vector<1x32xf32> to vector<16x32xf32>
    %33 = arith.addf %30, %32 : vector<16x32xf32>
    %cst_25 = arith.constant 0.000000e+00 : f32
    %34 = vector.broadcast %cst_25 : f32 to vector<16x32xf32>
    %35 = arith.maximumf %33, %34 : vector<16x32xf32>
    %c0_26 = arith.constant 0 : index
    %c0_27 = arith.constant 0 : index
    %36 = vector.load %arg11[%c0_26, %c0_27] : memref<16x32xf32, #tpu.memory_space<vmem>>, vector<16x32xf32>
    tpu.vector_store %arg11[%c0_26, %c0_27], %35 {strides = array<i32>} : memref<16x32xf32, #tpu.memory_space<vmem>>, vector<16x32xf32>,
    return
  }
  func.func @transform_0(%arg0: i32) -> (i32, i32) {
    %c0_i32 = arith.constant 0 : i32
    %c0_i32_0 = arith.constant 0 : i32
    %c0_i32_1 = arith.constant 0 : i32
    return %c0_i32, %c0_i32_0 : i32, i32
  }
  func.func @transform_1(%arg0: i32) -> (i32, i32) {
    %c0_i32 = arith.constant 0 : i32
    %c0_i32_0 = arith.constant 0 : i32
    %c0_i32_1 = arith.constant 0 : i32
    return %c0_i32, %c0_i32_0 : i32, i32
  }
  func.func @transform_2(%arg0: i32) -> (i32, i32) {
    %c0_i32 = arith.constant 0 : i32
    %c0_i32_0 = arith.constant 0 : i32
    %c0_i32_1 = arith.constant 0 : i32
    return %c0_i32, %c0_i32_0 : i32, i32
  }
  func.func @transform_3(%arg0: i32) -> (i32, i32) {
    %c0_i32 = arith.constant 0 : i32
    %c0_i32_0 = arith.constant 0 : i32
    %c0_i32_1 = arith.constant 0 : i32
    return %c0_i32, %c0_i32_0 : i32, i32
  }
  func.func @transform_4(%arg0: i32) -> (i32, i32) {
    %c0_i32 = arith.constant 0 : i32
    %c0_i32_0 = arith.constant 0 : i32
    %c0_i32_1 = arith.constant 0 : i32
    return %c0_i32, %c0_i32_0 : i32, i32
  }
  func.func @transform_5(%arg0: i32) -> (i32, i32) {
    %c0_i32 = arith.constant 0 : i32
    %c0_i32_0 = arith.constant 0 : i32
    %c0_i32_1 = arith.constant 0 : i32
    return %c0_i32, %c0_i32_0 : i32, i32
  }
  func.func @transform_6(%arg0: i32) -> (i32, i32) {
    %c0_i32 = arith.constant 0 : i32
    %c0_i32_0 = arith.constant 0 : i32
    %c0_i32_1 = arith.constant 0 : i32
    return %c0_i32, %c0_i32_0 : i32, i32
  }
  func.func @transform_7(%arg0: i32) -> (i32, i32) {
    %c0_i32 = arith.constant 0 : i32
    %c0_i32_0 = arith.constant 0 : i32
    %c0_i32_1 = arith.constant 0 : i32
    return %c0_i32, %c0_i32_0 : i32, i32
  }
  func.func @transform_8(%arg0: i32) -> (i32, i32) {
    %c0_i32 = arith.constant 0 : i32
    %c0_i32_0 = arith.constant 0 : i32
    %c0_i32_1 = arith.constant 0 : i32
    return %c0_i32, %c0_i32_0 : i32, i32
  }
  func.func @transform_9(%arg0: i32) -> (i32, i32) {
    %c0_i32 = arith.constant 0 : i32
    %c0_i32_0 = arith.constant 0 : i32
    %c0_i32_1 = arith.constant 0 : i32
    return %c0_i32, %c0_i32_0 : i32, i32
  }
  func.func @transform_10(%arg0: i32) -> (i32, i32) {
    %c0_i32 = arith.constant 0 : i32
    %c0_i32_0 = arith.constant 0 : i32
    %c0_i32_1 = arith.constant 0 : i32
    return %c0_i32, %c0_i32_0 : i32, i32
  }
}

</mosaic_0001>

<bundles_post_ra>
// kernel: tpu_custom_call.1
= control target key start
LH: loop header
LB: loop body
LE: loop exit
PB: predicated region body
PF: predicated region fallthrough
CT: control target
= control target key end

     0   :  { %v829_v2 = vmov 0   ;;  %s985_s0 = inlined_call_operand.vmem [shape: s32[32,1], index: 0, kind: input, shape index: {}]   ;;  %s986_s1 = inlined_call_operand.vmem [shape: s32[1,32], index: 1, kind: input, shape index: {}]   ;;  %s987_s2 = inlined_call_operand.vmem [shape: f32[16,6], index: 2, kind: input, shape index: {}]   ;;  %s988_s3 = inlined_call_operand.vmem [shape: f32[32,5], index: 3, kind: input, shape index: {}]   ;;  %s989_s4 = inlined_call_operand.vmem [shape: f32[6,32], index: 4, kind: input, shape index: {}]   ;;  %s990_s5 = inlined_call_operand.vmem [shape: f32[5,32], index: 5, kind: input, shape index: {}]   ;;  %s991_s6 = inlined_call_operand.vmem [shape: f32[1,32], index: 6, kind: input, shape index: {}]   ;;  %s992_s7 = inlined_call_operand.vmem [shape: f32[6,32], index: 7, kind: input, shape index: {}]   ;;  %s993_s8 = inlined_call_operand.vmem [shape: f32[32,32], index: 8, kind: input, shape index: {}]   ;;  %s994_s9 = inlined_call_operand.vmem [shape: f32[1,32], index: 9, kind: input, shape index: {}]   ;;  %s995_s10 = inlined_call_operand.hbm [shape: f32[16,32], index: 10, kind: output, shape index: {}]  }
   0x1   :  { %v42_v0 = vld [vmem:[%s985_s0 + $0x10] sm:$0xff]  ;;  %v40_v1 = vld [vmem:[%s985_s0] sm:$0xff]  ;;  %806 = vset.pattern.permute.xlu1 %v829_v2  ;;  %805 = vset.pattern.permute.xlu0 %v829_v2  ;;  %v898_v3 = vld [vmem:[%s987_s2 + $0x8] sm:$0xff] }
   0x2   :  { %51 = vperm.xlu1 %806, %v42_v0   ;;  %45 = vperm.xlu0 %805, %v40_v1   ;;  %v903_v4 = vld [vmem:[%s987_s2] sm:$0xff] }
   0x3   :  { %15 = vsyncpa [#allocation3], 0  ;;  %v43_v5 = vld [vmem:[%s985_s0 + $0x18] sm:$0xff]  ;;  %v41_v6 = vld [vmem:[%s985_s0 + $0x8] sm:$0xff]  ;;  %747 = vmatprep.subr.mxu0 %v898_v3  ;;  %vm185_vm0 = vcmask 1044480   ;;  %vm172_vm1 = vcmask 39936   ;;  %v38_v13 = vlaneseq }
   0x4   :  { %748 = vmatpush3.msra.mxu0 %v898_v3  ;;  %v171_v7 = vld [vmem:[%s990_s5] sm:$0x1f]  ;;  %v168_v9 = vld [vmem:[%s988_s3 + $0x8] sm:$0xff]  ;;  %vm287_vm2 = vcmask 1045504   ;;  %v169_v11 = vld [vmem:[%s988_s3 + $0x10] sm:$0xff]  ;;  %vm68_vm3 = vcmask 130048  }
   0x5   :  { %749 = vmatprep.subr.mxu0 %v903_v4  ;;  %v167_v8 = vld [vmem:[%s988_s3] sm:$0xff]  ;;  %757 = vmatprep.subr.msk.mxu1 %vm185_vm0, %v171_v7  ;;  %v170_v12 = vld [vmem:[%s988_s3 + $0x18] sm:$0xff]  ;;  %v39_v14 = vand.u32 127, %v38_v13  ;;  %v830_v17 = vmov 0.0   ;;  %vm274_vm8 = vcmask 48128   ;;  %v392_v28 = vshrl.u32 %v38_v13, 7 }
   0x6   :  { %54 = vperm.xlu1 %806, %v43_v5   ;;  %48 = vperm.xlu0 %805, %v41_v6   ;;  %v166_v10 = vld [vmem:[%s989_s4] sm:$0x3f]  ;;  %vm405_vm11 = vcmask 261120   ;;  %v491_v32 = vld [vmem:[%s993_s8 + $0x18] sm:$0xff]  ;;  %v490_v33 = vld [vmem:[%s993_s8 + $0x10] sm:$0xff] }
   0x7   :  { %750 = vmatpush3.msra.mxu0 %v903_v4  ;;  %759 = vmatprep.mubr.msk.f32.mxu1 %vm172_vm1, %v167_v8  ;;  %v393_v29 = vadd.s32 8, %v392_v28  ;;  %v705_v30 = vld [vmem:[%s986_s1] ss:$0 sm:$0xff]  ;;  %v489_v56 = vld [vmem:[%s993_s8 + $0x8] sm:$0xff] }
   0x8   :  { %758 = vmatpush3.msk.msra.mxu1 %vm185_vm0, %v171_v7  ;;  %vm399_vm9 = vcmp.eq.s32.totalorder %v392_v28, %v705_v30  ;;  %v704_v43 = vld [vmem:[%s991_s6] ss:$0 sm:$0xff] }
   0x9   :  { %760 = vmatmul.mubr.msk.f32.vlgmr.msra.gmra.mxu1 %vm172_vm1, %v168_v9  ;;  %765 = vmatprep.subr.msk.mxu1 %vm287_vm2, %v166_v10  ;;  %vm400_vm10 = vcmp.eq.s32.totalorder %v393_v29, %v705_v30  ;;  %v706_v31 = vsel %vm399_vm9, 1.0, %v830_v17  ;;  %v487_v57 = vld [vmem:[%s992_s7] sm:$0x3f] }
   0xa   :  { %762 = vmatprep.mubr.msk.f32.mxu1 %vm172_vm1, %v169_v11  ;;  %766 = vmatpush3.msk.msra.mxu1 %vm287_vm2, %v166_v10  ;;  %v707_v55 = vsel %vm400_vm10, 1.0, %v830_v17  ;;  %v488_v58 = vld [vmem:[%s993_s8] sm:$0xff]  ;;  %s831_s8 = smov [#allocation2]  }
   0xb   :  { %784 = vmatprep.subr.mxu1 %v491_v32  ;;  %v715_v63 = vld [vmem:[%s994_s9] ss:$0 sm:$0xff]  ;;  %s675_s2 = sshll.u32 %s831_s8, 4  ;;  %s676_s2 = int_to_ptr.vmem [resolvable:$true] %s675_s2 }
   0xc   :  { %s807_s25 = scalar_lea.vmem %s676_s2, 256  ;;  %p812_p1 = scmp.lt.s32.totalorder %s676_s2, %s676_s2 }
   0xd   :  { %763 = vmatmul.mubr.msk.f32.gmra.mxu1 %vm172_vm1, %v170_v12  ;;  %p808_p0 = scmp.ne.s32.totalorder %s676_s2, %s807_s25  ;;  %p813_p2 = scmp.lt.s32.totalorder %s807_s25, %s807_s25 }
   0xf   :  { %p814_p3 = por %p813_p2, %p812_p1 }
  0x11   :  { %p815_p4 = pnand %p814_p3, %p808_p0 }
  0x7d   :  { %v52_v15 = vpop.permute.xlu1 %51  ;;  %v46_v16 = vpop.permute.xlu0 %45 }
  0x7e   :  { %vm56_vm4 = vcmp.eq.s32.totalorder %v39_v14, %v46_v16  ;;  %vm58_vm5 = vcmp.eq.s32.totalorder %v39_v14, %v52_v15 }
  0x7f   :  { %v686_v18 = vsel %vm56_vm4, 1.0, %v830_v17  ;;  %v688_v21 = vsel %vm58_vm5, 1.0, %v830_v17 }
  0x80   :  { %751 = vmatprep.mubr.msk.f32.mxu0 %vm68_vm3, %v686_v18 }
  0x81   :  { %v55_v19 = vpop.permute.xlu1 %54  ;;  %v49_v20 = vpop.permute.xlu0 %48 }
  0x82   :  { %vm57_vm6 = vcmp.eq.s32.totalorder %v39_v14, %v49_v20  ;;  %vm59_vm7 = vcmp.eq.s32.totalorder %v39_v14, %v55_v19 }
  0x83   :  { %v687_v22 = vsel %vm57_vm6, 1.0, %v830_v17  ;;  %v689_v23 = vsel %vm59_vm7, 1.0, %v830_v17 }
  0x84   :  { %752 = vmatmul.mubr.msk.f32.vlgmr.msra.gmra.mxu0 %vm68_vm3, %v687_v22 }
  0x85   :  { %754 = vmatprep.mubr.msk.f32.mxu0 %vm68_vm3, %v688_v21 }
  0x88   :  { %755 = vmatmul.mubr.msk.f32.gmra.mxu0 %vm68_vm3, %v689_v23 }
  0x89   :  { %781 = vmatprep.mubr.msk.f32.mxu0 %vm405_vm11, %v706_v31 }
  0xc9   :  { %v761_v34 = vpop.f32.mrf.mxu1 }
  0xcb   :  { %v255_v35 = vpop.f32.mrf.mxu1 }
  0xcd   :  { %v764_v36 = vpop.f32.mrf.mxu1 }
  0xcf   :  { %v265_v37 = vpop.f32.mrf.mxu1 }
 0x144   :  { %v753_v24 = vpop.f32.mrf.mxu0 }
 0x146   :  { %v147_v25 = vpop.f32.mrf.mxu0 }
 0x147   :  { %767 = vmatprep.mubr.msk.f32.mxu1 %vm274_vm8, %v147_v25 }
 0x148   :  { %v756_v26 = vpop.f32.mrf.mxu0  ;;  %768 = vmatmul.mubr.msk.f32.vlgmr.msra.gmra.mxu1 %vm274_vm8, %v753_v24 }
 0x149   :  { %785 = vmatpush3.msra.mxu1 %v491_v32 }
 0x14a   :  { %v157_v27 = vpop.f32.mrf.mxu0  ;;  %786 = vmatprep.subr.mxu1 %v490_v33 }
 0x14b   :  { %770 = vmatprep.mubr.msk.f32.mxu1 %vm274_vm8, %v157_v27  ;;  %787 = vmatpush3.msra.mxu1 %v490_v33 }
 0x14c   :  { %771 = vmatmul.mubr.msk.f32.gmra.mxu1 %vm274_vm8, %v756_v26  ;;  %788 = vmatprep.subr.mxu1 %v489_v56 }
 0x14d   :  { %789 = vmatpush3.msra.mxu1 %v489_v56 }
 0x14e   :  { %790 = vmatprep.subr.mxu1 %v488_v58 }
 0x14f   :  { %791 = vmatpush3.msra.mxu1 %v488_v58 }
 0x208   :  { %v769_v38 = vpop.f32.mrf.mxu1 }
 0x209   :  { %v363_v41 = vadd.f32 %v769_v38, %v761_v34 }
 0x20a   :  { %v357_v39 = vpop.f32.mrf.mxu1 }
 0x20b   :  { %v358_v45 = vadd.f32 %v357_v39, %v255_v35  ;;  %v384_v48 = vadd.f32 %v704_v43, %v363_v41 }
 0x20c   :  { %v772_v40 = vpop.f32.mrf.mxu1 }
 0x20d   :  { %v373_v42 = vadd.f32 %v772_v40, %v764_v36  ;;  %v383_v51 = vadd.f32 %v704_v43, %v358_v45  ;;  %v388_v53 = vmax.f32 %v384_v48, 0.0 }
 0x20e   :  { %v367_v44 = vpop.f32.mrf.mxu1 }
 0x20f   :  { %v386_v46 = vadd.f32 %v704_v43, %v373_v42  ;;  %v368_v47 = vadd.f32 %v367_v44, %v265_v37  ;;  %v387_v54 = vmax.f32 %v383_v51, 0.0 }
 0x211   :  { %v390_v49 = vmax.f32 %v386_v46, 0.0  ;;  %v385_v50 = vadd.f32 %v704_v43, %v368_v47 }
 0x213   :  { %v389_v52 = vmax.f32 %v385_v50, 0.0  ;;  %773 = vmatprep.subr.mxu0 %v390_v49 }
 0x214   :  { %774 = vmatpush3.msra.mxu0 %v390_v49 }
 0x215   :  { %775 = vmatprep.subr.mxu0 %v389_v52 }
 0x216   :  { %776 = vmatpush3.msra.mxu0 %v389_v52 }
 0x217   :  { %777 = vmatprep.subr.mxu0 %v388_v53 }
 0x218   :  { %778 = vmatpush3.msra.mxu0 %v388_v53 }
 0x219   :  { %779 = vmatprep.subr.mxu0 %v387_v54 }
 0x21a   :  { %780 = vmatpush3.msra.mxu0 %v387_v54 }
 0x21b   :  { %782 = vmatmul.mubr.msk.f32.vlgmr.msra.gmra.mxu0 %vm405_vm11, %v707_v55  ;;  %795 = vmatprep.subr.msk.mxu0 %vm287_vm2, %v487_v57 }
 0x21c   :  { %797 = vmatprep.mubr.msk.f32.mxu0 %vm274_vm8, %v903_v4  ;;  %796 = vmatpush3.msk.msra.mxu0 %vm287_vm2, %v487_v57 }
 0x21f   :  { %798 = vmatmul.mubr.msk.f32.vlgmr.msra.gmra.mxu0 %vm274_vm8, %v898_v3 }
 0x2db   :  { %v783_v59 = vpop.f32.mrf.mxu0 }
 0x2dd   :  { %v478_v60 = vpop.f32.mrf.mxu0 }
 0x2de   :  { %792 = vmatprep.mubr.msk.f32.mxu1 %vm405_vm11, %v478_v60 }
 0x2df   :  { %793 = vmatmul.mubr.msk.f32.vlgmr.msra.gmra.mxu1 %vm405_vm11, %v783_v59  ;;  %v799_v61 = vpop.f32.mrf.mxu0 }
 0x2e1   :  { %v648_v1 = vpop.f32.mrf.mxu0 }
 0x39f   :  { %v794_v62 = vpop.f32.mrf.mxu1 }
 0x3a0   :  { %v654_v0 = vadd.f32 %v799_v61, %v794_v62 }
 0x3a1   :  { %v564_v2 = vpop.f32.mrf.mxu1 }
 0x3a2   :  { %v665_v4 = vadd.f32 %v715_v63, %v654_v0  ;;  %v649_v5 = vadd.f32 %v648_v1, %v564_v2 }
 0x3a4   :  { %v667_v3 = vmax.f32 %v665_v4, 0.0  ;;  %v664_v6 = vadd.f32 %v715_v63, %v649_v5 }
 0x3a6   :  { %669 = vst.msk [vmem:[#allocation2 + $0x8] sm:$0xff] %vm405_vm11, %v667_v3  ;;  %v666_v7 = vmax.f32 %v664_v6, 0.0 }
 0x3a8   :  { %668 = vst.msk [vmem:[#allocation2] sm:$0xff] %vm405_vm11, %v666_v7 }
 0x3a9   :  { %818 = shalt.err (!%p815_p4)
}
 0x3aa   :  { %s832_s9 = smov 128   ;;  %s833_s26 = smov 8  }
 0x3ab   :  { %681 = dma.vmem_to_hbm [thread:$0]  %s676_s2, 256, %s995_s10, [#allocation3], %s832_s9, %s832_s9, %s833_s26  }
 0x3ac   :  { %827 = dma.done.wait [#allocation3], 256  }
 0x3ad   :  { %828 = vsyncadd [#allocation3], 4294967040 }
 0x3ae   :  { %685 = vsyncpa [#allocation3], 1 }

</bundles_post_ra>
